<compile_context>
chip_gen: v5e
topology: v5e:2x2
jax: 0.10.0
libtpu: 0.0.40
codegen_flags: <defaults>
</compile_context>

<pallas_src>
import functools
import math

import jax
import jax.numpy as jnp
from jax.experimental import pallas as pl
from jax.experimental.pallas import tpu as pltpu


def _merger_kernel(x_ref, a_ref, m1t_ref, wvo_ref, vec_ref, o_ref, *, eps):
    """One grid step = TB batch elements (the attention query length is 1).

    x_ref   : (TB, S, C)  ensemble members for TB batch elements
    a_ref   : (C, H)      folded (Wk^T * q_proj) @ M1 / sqrt(head_dim)
    m1t_ref : (H, C)      head -> channel broadcast (0/1 block matrix)
    wvo_ref : (2, C, C)   stacked [Wv^T, Wo^T]
    vec_ref : (8, C)      rows: [query, bv, bo, gamma, beta, 0, 0, 0]
    o_ref   : (1, TB, C)
    """
    tb, s, c = x_ref.shape
    h = a_ref.shape[1]

    # One MXU-friendly slab of TB*S rows (free relayout when S is a multiple of 8).
    x2 = x_ref[...].reshape(tb * s, c)

    # Attention scores per (row, head); query/key projections and the 1/sqrt(d)
    # scale are folded into a_ref in the wrapper (batch independent).
    scores = jnp.dot(x2, a_ref[...], preferred_element_type=jnp.float32)   # (TB*S, H)

    # Softmax over the ensemble axis S, separately per (batch, head).
    s3 = scores.reshape(tb, s, h)
    m = jnp.max(s3, axis=1, keepdims=True)
    e = jnp.exp(s3 - m)
    denom = jnp.sum(e, axis=1, keepdims=True)
    w = (e * pl.reciprocal(denom)).reshape(tb * s, h)   # EUP reciprocal, no VALU divide

    vecs = vec_ref[...]                                                    # (8, C)
    # Value projection for all TB*S rows at once (+ bv).
    vp = jnp.dot(x2, wvo_ref[0], preferred_element_type=jnp.float32) + vecs[1:2]
    # Broadcast the per-head weights back to their channel blocks, reduce over S.
    w_exp = jnp.dot(w, m1t_ref[...], preferred_element_type=jnp.float32)   # (TB*S, C)
    attn = jnp.sum((w_exp * vp).reshape(tb, s, c), axis=1)                 # (TB, C)

    # Output projection + residual (broadcast learned query) + LayerNorm.
    out = jnp.dot(attn, wvo_ref[1], preferred_element_type=jnp.float32) + vecs[2:3]
    resid = vecs[0:1] + out
    mu = jnp.mean(resid, axis=-1, keepdims=True)
    var = jnp.mean((resid - mu) ** 2, axis=-1, keepdims=True)
    y = (resid - mu) * jax.lax.rsqrt(var + eps) * vecs[3:4] + vecs[4:5]

    o_ref[0] = y.astype(o_ref.dtype)


def _pick_batch_block(batch, members, target_rows=256):
    """TB batch elements per grid step: aim for TB*S ~ target_rows MXU rows while
    keeping >= 2 grid steps when the batch allows, so the 'parallel' grid axis
    can be sharded across TensorCores on multi-core chips (v7x)."""
    tb = max(1, target_rows // max(members, 1))
    if batch > 1:
        tb = min(tb, (batch + 1) // 2)
    return max(1, min(tb, batch))


def weighted_mean_merger(x, params, *, num_heads, keepdim=False, dim=-2, eps=1e-5,
                         batch_block=None):
    B, S, C = x.shape
    H = num_heads
    assert C % H == 0, "channels must be divisible by num_heads"
    d = C // H
    f32 = jnp.float32

    query = params["query"].reshape(1, C).astype(f32)
    wkT = params["wk"].T.astype(f32)
    wvT = params["wv"].T.astype(f32)
    woT = params["wo"].T.astype(f32)

    # Batch-independent query projection (reviewer item 1: hoist out of the kernel).
    qp = query @ params["wq"].T.astype(f32) + params["bq"].reshape(1, C).astype(f32)

    # Block-structured head-membership matrix: M1[c, h] = 1 iff channel c is in head h.
    heads_of_c = jnp.arange(C) // d
    m1 = (heads_of_c[:, None] == jnp.arange(H)[None, :]).astype(f32)       # (C, H)
    m1t = m1.T                                                             # (H, C)

    # Fold query projection, key projection, per-head reduction and 1/sqrt(d)
    # into one (C, H) matrix:  scores = x @ a_mat (+ const_h).  The bk-dependent
    # per-head constant is the same for every ensemble member, so it cancels in
    # the softmax over S and is dropped.
    a_mat = ((wkT * qp) @ m1) * (1.0 / math.sqrt(d))                       # (C, H)

    # Stack the remaining constants (reviewer item 9: fewer, bigger operands).
    wvo = jnp.stack([wvT, woT], axis=0)                                    # (2, C, C)
    vecs = jnp.zeros((8, C), f32)                                          # sublane-aligned
    vecs = vecs.at[0].set(query[0])
    vecs = vecs.at[1].set(params["bv"].astype(f32))
    vecs = vecs.at[2].set(params["bo"].astype(f32))
    vecs = vecs.at[3].set(params["gamma"].astype(f32))
    vecs = vecs.at[4].set(params["beta"].astype(f32))

    tb = batch_block if batch_block is not None else _pick_batch_block(B, S)
    nb = pl.cdiv(B, tb)
    b_pad = nb * tb
    x_pad = jnp.pad(x, ((0, b_pad - B), (0, 0), (0, 0))) if b_pad != B else x

    kernel = functools.partial(_merger_kernel, eps=eps)
    const2d = lambda b: (0, 0)

    out = pl.pallas_call(
        kernel,
        out_shape=jax.ShapeDtypeStruct((nb, tb, C), x.dtype),
        grid=(nb,),
        in_specs=[
            pl.BlockSpec((tb, S, C), lambda b: (b, 0, 0)),   # ensemble slab: TB batches
            pl.BlockSpec((C, H), const2d),                   # folded q/k projection + scale
            pl.BlockSpec((H, C), const2d),                   # head -> channel broadcast
            pl.BlockSpec((2, C, C), lambda b: (0, 0, 0)),    # [Wv^T, Wo^T]
            pl.BlockSpec((8, C), const2d),                   # stacked per-channel vectors
        ],
        out_specs=pl.BlockSpec((1, tb, C), lambda b: (b, 0, 0)),
        compiler_params=pltpu.CompilerParams(
            dimension_semantics=("parallel",),
            # Explicit scoped-VMEM budget; plenty for these constants + a double-
            # buffered x slab.  For large C, single-buffer / K-tile the (C, C)
            # weights instead of raising this further (v7x has 64 MiB VMEM).
            vmem_limit_bytes=32 * 1024 * 1024,
        ),
    )(x_pad, a_mat, m1t, wvo, vecs)

    out = out.reshape(b_pad, C)[:B]        # drop batch padding
    out = out[:, None, :]                  # (B, 1, C): torch keeps the query-length axis
    if keepdim:
        return out
    return jnp.squeeze(out, axis=dim)


def ref_forward(x, params, *, num_heads, eps=1e-5):
    """Pure-JAX reference matching torch nn.MultiheadAttention + LayerNorm."""
    B, S, C = x.shape
    H = num_heads
    d = C // H
    q = params["query"]                                   # (1, 1, C)
    qr = jnp.broadcast_to(q, (B, 1, C))
    qp = qr @ params["wq"].T + params["bq"]
    kp = x @ params["wk"].T + params["bk"]
    vp = x @ params["wv"].T + params["bv"]
    qh = qp.reshape(B, 1, H, d).transpose(0, 2, 1, 3)
    kh = kp.reshape(B, S, H, d).transpose(0, 2, 1, 3)
    vh = vp.reshape(B, S, H, d).transpose(0, 2, 1, 3)
    s = jnp.einsum("bhqd,bhkd->bhqk", qh, kh) / math.sqrt(d)
    w = jax.nn.softmax(s, axis=-1)
    o = jnp.einsum("bhqk,bhkd->bhqd", w, vh).transpose(0, 2, 1, 3).reshape(B, 1, C)
    o = o @ params["wo"].T + params["bo"]
    resid = q + o
    mu = resid.mean(-1, keepdims=True)
    var = ((resid - mu) ** 2).mean(-1, keepdims=True)
    y = (resid - mu) / jnp.sqrt(var + eps) * params["gamma"] + params["beta"]
    return y.squeeze(-2)


def init_params(key, channels):
    C = channels
    ks = jax.random.split(key, 8)
    lim_in = math.sqrt(6.0 / (C + 3 * C))      # xavier-uniform on in_proj_weight (3C, C)
    lim_out = math.sqrt(6.0 / (C + C))
    in_proj_w = jax.random.uniform(ks[0], (3 * C, C), minval=-lim_in, maxval=lim_in,
                                   dtype=jnp.float32)
    return {
        "query": (jax.random.uniform(ks[1], (1, 1, C), dtype=jnp.float32) - 0.5) / 10.0,
        "wq": in_proj_w[:C],
        "wk": in_proj_w[C:2 * C],
        "wv": in_proj_w[2 * C:],
        "bq": 0.01 * jax.random.normal(ks[2], (C,), dtype=jnp.float32),
        "bk": 0.01 * jax.random.normal(ks[3], (C,), dtype=jnp.float32),
        "bv": 0.01 * jax.random.normal(ks[4], (C,), dtype=jnp.float32),
        "wo": jax.random.uniform(ks[5], (C, C), minval=-lim_out, maxval=lim_out,
                                 dtype=jnp.float32),
        "bo": 0.01 * jax.random.normal(ks[6], (C,), dtype=jnp.float32),
        "gamma": jnp.ones((C,), jnp.float32),  # LayerNorm default init
        "beta": jnp.zeros((C,), jnp.float32),
    }


if __name__ == "__main__":
    B, S, C, H = 2, 8, 32, 8      # batch, ensemble members, channels, heads
    key = jax.random.PRNGKey(0)
    pkey, xkey = jax.random.split(key)
    params = init_params(pkey, C)
    x = jax.random.normal(xkey, (B, S, C), dtype=jnp.float32)

    out = weighted_mean_merger(x, params, num_heads=H, keepdim=False)
    out = jax.block_until_ready(out)

    ref = ref_forward(x, params, num_heads=H)
    assert out.shape == (B, C), out.shape
    # f32 tolerance: the wrapper folds/re-associates the q/k projections, so
    # results match the reference to float32 rounding, not bit-exactly.
    assert jnp.allclose(out, ref, atol=1e-4, rtol=1e-4), float(jnp.abs(out - ref).max())
    print("KERNEL_OK")
</pallas_src>

<mosaic_0001>
module attributes {stable_mosaic.version = 11 : i64} {
  func.func @_merger_kernel(%arg0: i32, %arg1: memref<1x8x32xf32, #tpu.memory_space<vmem>>, %arg2: memref<32x8xf32, #tpu.memory_space<vmem>>, %arg3: memref<8x32xf32, #tpu.memory_space<vmem>>, %arg4: memref<2x32x32xf32, #tpu.memory_space<vmem>>, %arg5: memref<8x32xf32, #tpu.memory_space<vmem>>, %arg6: memref<1x1x32xf32, #tpu.memory_space<vmem>>) attributes {dimension_semantics = [#tpu.dimension_semantics<parallel>], iteration_bounds = array<i64: 2>, scalar_prefetch = 0 : i64, scratch_operands = 0 : i64, tpu.core_type = #tpu.core_type<tc>, window_params = [{transform_indices = @transform_0, window_bounds = array<i64: 1, 8, 32>}, {pipeline_mode = #tpu.pipeline_mode<synchronous>, transform_indices = @transform_1, window_bounds = array<i64: 32, 8>}, {pipeline_mode = #tpu.pipeline_mode<synchronous>, transform_indices = @transform_2, window_bounds = array<i64: 8, 32>}, {pipeline_mode = #tpu.pipeline_mode<synchronous>, transform_indices = @transform_3, window_bounds = array<i64: 2, 32, 32>}, {pipeline_mode = #tpu.pipeline_mode<synchronous>, transform_indices = @transform_4, window_bounds = array<i64: 8, 32>}, {transform_indices = @transform_5, window_bounds = array<i64: 1, 1, 32>}]} {
    %c0 = arith.constant 0 : index
    %c0_0 = arith.constant 0 : index
    %c0_1 = arith.constant 0 : index
    %0 = vector.load %arg1[%c0, %c0_0, %c0_1] : memref<1x8x32xf32, #tpu.memory_space<vmem>>, vector<1x8x32xf32>
    %1 = vector.shape_cast %0 : vector<1x8x32xf32> to vector<8x32xf32>
    %c0_2 = arith.constant 0 : index
    %c0_3 = arith.constant 0 : index
    %2 = vector.load %arg2[%c0_2, %c0_3] : memref<32x8xf32, #tpu.memory_space<vmem>>, vector<32x8xf32>
    %cst = arith.constant dense<0.000000e+00> : vector<8x8xf32>
    %3 = tpu.matmul %1, %2, %cst {dimension_numbers = #tpu.dot_dimension_numbers<[1], [0], [0], [1], [0, 0, 1, 1], [], []>} : vector<8x32xf32>, vector<32x8xf32>, vector<8x8xf32> -> vector<8x8xf32>
    %4 = vector.shape_cast %3 : vector<8x8xf32> to vector<1x8x8xf32>
    %cst_4 = arith.constant dense<0xFF800000> : vector<1x8xf32>
    %5 = vector.multi_reduction <maximumf>, %4, %cst_4 [1] : vector<1x8x8xf32> to vector<1x8xf32>
    %6 = vector.shape_cast %5 : vector<1x8xf32> to vector<1x1x8xf32>
    %7 = vector.broadcast %6 : vector<1x1x8xf32> to vector<1x8x8xf32>
    %8 = arith.subf %4, %7 : vector<1x8x8xf32>
    %9 = math.exp %8 : vector<1x8x8xf32>
    %cst_5 = arith.constant dense<0.000000e+00> : vector<1x8xf32>
    %10 = vector.multi_reduction <add>, %9, %cst_5 [1] : vector<1x8x8xf32> to vector<1x8xf32>
    %11 = vector.shape_cast %10 : vector<1x8xf32> to vector<1x1x8xf32>
    %12 = tpu.reciprocal %11 : vector<1x1x8xf32> -> vector<1x1x8xf32>
    %13 = vector.broadcast %12 : vector<1x1x8xf32> to vector<1x8x8xf32>
    %14 = arith.mulf %9, %13 : vector<1x8x8xf32>
    %15 = vector.shape_cast %14 : vector<1x8x8xf32> to vector<8x8xf32>
    %c0_6 = arith.constant 0 : index
    %c0_7 = arith.constant 0 : index
    %16 = vector.load %arg5[%c0_6, %c0_7] : memref<8x32xf32, #tpu.memory_space<vmem>>, vector<8x32xf32>
    %c0_8 = arith.constant 0 : index
    %c0_9 = arith.constant 0 : index
    %c0_10 = arith.constant 0 : index
    %17 = vector.load %arg4[%c0_8, %c0_9, %c0_10] : memref<2x32x32xf32, #tpu.memory_space<vmem>>, vector<1x32x32xf32>
    %18 = vector.shape_cast %17 : vector<1x32x32xf32> to vector<32x32xf32>
    %cst_11 = arith.constant dense<0.000000e+00> : vector<8x32xf32>
    %19 = tpu.matmul %1, %18, %cst_11 {dimension_numbers = #tpu.dot_dimension_numbers<[1], [0], [0], [1], [0, 0, 1, 1], [], []>} : vector<8x32xf32>, vector<32x32xf32>, vector<8x32xf32> -> vector<8x32xf32>
    %20 = vector.extract_strided_slice %16 {offsets = [1, 0], sizes = [1, 32], strides = [1, 1]} : vector<8x32xf32> to vector<1x32xf32>
    %21 = vector.broadcast %20 : vector<1x32xf32> to vector<8x32xf32>
    %22 = arith.addf %19, %21 : vector<8x32xf32>
    %c0_12 = arith.constant 0 : index
    %c0_13 = arith.constant 0 : index
    %23 = vector.load %arg3[%c0_12, %c0_13] : memref<8x32xf32, #tpu.memory_space<vmem>>, vector<8x32xf32>
    %cst_14 = arith.constant dense<0.000000e+00> : vector<8x32xf32>
    %24 = tpu.matmul %15, %23, %cst_14 {dimension_numbers = #tpu.dot_dimension_numbers<[1], [0], [0], [1], [0, 0, 1, 1], [], []>} : vector<8x8xf32>, vector<8x32xf32>, vector<8x32xf32> -> vector<8x32xf32>
    %25 = arith.mulf %24, %22 : vector<8x32xf32>
    %26 = vector.shape_cast %25 : vector<8x32xf32> to vector<1x8x32xf32>
    %cst_15 = arith.constant dense<0.000000e+00> : vector<1x32xf32>
    %27 = vector.multi_reduction <add>, %26, %cst_15 [1] : vector<1x8x32xf32> to vector<1x32xf32>
    %c1 = arith.constant 1 : index
    %c0_16 = arith.constant 0 : index
    %c0_17 = arith.constant 0 : index
    %28 = vector.load %arg4[%c1, %c0_16, %c0_17] : memref<2x32x32xf32, #tpu.memory_space<vmem>>, vector<1x32x32xf32>
    %29 = vector.shape_cast %28 : vector<1x32x32xf32> to vector<32x32xf32>
    %cst_18 = arith.constant dense<0.000000e+00> : vector<1x32xf32>
    %30 = tpu.matmul %27, %29, %cst_18 {dimension_numbers = #tpu.dot_dimension_numbers<[1], [0], [0], [1], [0, 0, 1, 1], [], []>} : vector<1x32xf32>, vector<32x32xf32>, vector<1x32xf32> -> vector<1x32xf32>
    %31 = vector.extract_strided_slice %16 {offsets = [2, 0], sizes = [1, 32], strides = [1, 1]} : vector<8x32xf32> to vector<1x32xf32>
    %32 = arith.addf %30, %31 : vector<1x32xf32>
    %33 = vector.extract_strided_slice %16 {offsets = [0, 0], sizes = [1, 32], strides = [1, 1]} : vector<8x32xf32> to vector<1x32xf32>
    %34 = arith.addf %33, %32 : vector<1x32xf32>
    %cst_19 = arith.constant dense<0.000000e+00> : vector<1xf32>
    %35 = vector.multi_reduction <add>, %34, %cst_19 [1] : vector<1x32xf32> to vector<1xf32>
    %36 = vector.shape_cast %35 : vector<1xf32> to vector<1x1xf32>
    %cst_20 = arith.constant 3.200000e+01 : f32
    %37 = vector.broadcast %cst_20 : f32 to vector<1x1xf32>
    %38 = arith.divf %36, %37 : vector<1x1xf32>
    %39 = vector.broadcast %38 : vector<1x1xf32> to vector<1x32xf32>
    %40 = arith.subf %34, %39 : vector<1x32xf32>
    %41 = arith.mulf %40, %40 : vector<1x32xf32>
    %cst_21 = arith.constant dense<0.000000e+00> : vector<1xf32>
    %42 = vector.multi_reduction <add>, %41, %cst_21 [1] : vector<1x32xf32> to vector<1xf32>
    %43 = vector.shape_cast %42 : vector<1xf32> to vector<1x1xf32>
    %cst_22 = arith.constant 3.200000e+01 : f32
    %44 = vector.broadcast %cst_22 : f32 to vector<1x1xf32>
    %45 = arith.divf %43, %44 : vector<1x1xf32>
    %46 = vector.broadcast %38 : vector<1x1xf32> to vector<1x32xf32>
    %47 = arith.subf %34, %46 : vector<1x32xf32>
    %cst_23 = arith.constant 9.99999974E-6 : f32
    %48 = vector.broadcast %cst_23 : f32 to vector<1x1xf32>
    %49 = arith.addf %45, %48 : vector<1x1xf32>
    %50 = math.rsqrt %49 : vector<1x1xf32>
    %51 = vector.broadcast %50 : vector<1x1xf32> to vector<1x32xf32>
    %52 = arith.mulf %47, %51 : vector<1x32xf32>
    %53 = vector.extract_strided_slice %16 {offsets = [3, 0], sizes = [1, 32], strides = [1, 1]} : vector<8x32xf32> to vector<1x32xf32>
    %54 = arith.mulf %52, %53 : vector<1x32xf32>
    %55 = vector.extract_strided_slice %16 {offsets = [4, 0], sizes = [1, 32], strides = [1, 1]} : vector<8x32xf32> to vector<1x32xf32>
    %56 = arith.addf %54, %55 : vector<1x32xf32>
    %c0_24 = arith.constant 0 : index
    %c0_25 = arith.constant 0 : index
    %c0_26 = arith.constant 0 : index
    %57 = vector.load %arg6[%c0_24, %c0_25, %c0_26] : memref<1x1x32xf32, #tpu.memory_space<vmem>>, vector<1x1x32xf32>
    %58 = vector.shape_cast %57 : vector<1x1x32xf32> to vector<1x32xf32>
    %59 = vector.shape_cast %56 : vector<1x32xf32> to vector<1x1x32xf32>
    tpu.vector_store %arg6[%c0_24, %c0_25, %c0_26], %59 {strides = array<i32>} : memref<1x1x32xf32, #tpu.memory_space<vmem>>, vector<1x1x32xf32>,
    return
  }
  func.func @transform_0(%arg0: i32) -> (i32, i32, i32) {
    %c0_i32 = arith.constant 0 : i32
    %c0_i32_0 = arith.constant 0 : i32
    %c0_i32_1 = arith.constant 0 : i32
    return %arg0, %c0_i32, %c0_i32_0 : i32, i32, i32
  }
  func.func @transform_1(%arg0: i32) -> (i32, i32) {
    %c0_i32 = arith.constant 0 : i32
    %c0_i32_0 = arith.constant 0 : i32
    %c0_i32_1 = arith.constant 0 : i32
    return %c0_i32, %c0_i32_0 : i32, i32
  }
  func.func @transform_2(%arg0: i32) -> (i32, i32) {
    %c0_i32 = arith.constant 0 : i32
    %c0_i32_0 = arith.constant 0 : i32
    %c0_i32_1 = arith.constant 0 : i32
    return %c0_i32, %c0_i32_0 : i32, i32
  }
  func.func @transform_3(%arg0: i32) -> (i32, i32, i32) {
    %c0_i32 = arith.constant 0 : i32
    %c0_i32_0 = arith.constant 0 : i32
    %c0_i32_1 = arith.constant 0 : i32
    %c0_i32_2 = arith.constant 0 : i32
    return %c0_i32, %c0_i32_0, %c0_i32_1 : i32, i32, i32
  }
  func.func @transform_4(%arg0: i32) -> (i32, i32) {
    %c0_i32 = arith.constant 0 : i32
    %c0_i32_0 = arith.constant 0 : i32
    %c0_i32_1 = arith.constant 0 : i32
    return %c0_i32, %c0_i32_0 : i32, i32
  }
  func.func @transform_5(%arg0: i32) -> (i32, i32, i32) {
    %c0_i32 = arith.constant 0 : i32
    %c0_i32_0 = arith.constant 0 : i32
    %c0_i32_1 = arith.constant 0 : i32
    return %arg0, %c0_i32, %c0_i32_0 : i32, i32, i32
  }
}

</mosaic_0001>

<bundles_post_ra>
// kernel: tpu_custom_call.1
= control target key start
LH: loop header
LB: loop body
LE: loop exit
PB: predicated region body
PF: predicated region fallthrough
CT: control target
= control target key end

     0   :  { %10 = vsyncpa [#allocation3], 0  ;;  %s834_s0 = inlined_call_operand.vmem [shape: f32[2,8,32], index: 0, kind: input, shape index: {}]   ;;  %s835_s1 = inlined_call_operand.vmem [shape: f32[32,8], index: 1, kind: input, shape index: {}]   ;;  %s836_s2 = inlined_call_operand.vmem [shape: f32[8,32], index: 2, kind: input, shape index: {}]   ;;  %s837_s3 = inlined_call_operand.hbm [shape: f32[2,32,32], index: 3, kind: input, shape index: {}]   ;;  %s838_s4 = inlined_call_operand.vmem [shape: f32[8,32], index: 4, kind: input, shape index: {}]   ;;  %s839_s5 = inlined_call_operand.hbm [shape: f32[2,1,32], index: 5, kind: output, shape index: {}]  }
   0x1   :  { %11 = vsyncpa [#allocation4], 0 }
   0x2   :  { %13 = vsyncpa [#allocation4 + $0x1], 0  ;;  %s711_s18 = smov 0   ;;  %s713_s19 = smov 0  }
   0x3   :  { %s715_s20 = smov 0   ;;  %s717_s21 = smov 0  }
   0x4 LB: > { %s732_s22 = sadd.s32 4294967295, %s675_s21   ;;  %s505_s23 = sadd.s32 4294967294, %s675_s21   ;;  %s675_s21 = sphi %s717_s21, %s845_s21   ;;  %s671_s20 = sphi %s715_s20, %s844_s20   ;;  %s667_s19 = sphi %s713_s19, %s843_s19   ;;  %s663_s18 = sphi %s711_s18, %s842_s18  }
   0x5   : > { %s736_s24 = sadd.s32 1, %s675_s21   ;;  %s136_s25 = sadd.s32 1, %s671_s20 }
   0x6   : > { %s133_s26 = ssub.s32 %s675_s21, %s736_s24  ;;  %p146_p0 = scmp.ne.s32.totalorder %s671_s20, %s667_s19 }
   0x7   : > { %p134_p1 = scmp.eq.s32.totalorder %s133_s26, 0  ;;  %p147_p2 = scmp.eq.s32.totalorder %s732_s22, 1 }
   0x8   : > { %p152_p3 = scmp.ne.s32.totalorder %s667_s19, %s663_s18  ;;  %p153_p4 = scmp.eq.s32.totalorder %s505_s23, 1 }
   0x9   : > { %s747_s27 = scalar_select %p134_p1, %s671_s20, %s136_s25  }
   0xa   : > { %p749_p5 = por %p147_p2, %p146_p0  ;;  %p753_p6 = por %p153_p4, %p152_p3 }
   0xb   : > { %p506_p7 = scmp.ge.s32.totalorder %s675_s21, 1  ;;  %p160_p8 = scmp.lt.s32.totalorder %s675_s21, 3 }
   0xc   : > { %p532_p9 = scmp.eq.s32.totalorder %s732_s22, 0  ;;  %s177_s7 = sshll.u32 %s837_s3, 4  ;;  %s178_s7 = int_to_ptr.hbm [resolvable:$true] %s177_s7 }
   0xd   : > { %p161_p10 = pnand %p506_p7, %p160_p8  ;;  %s677_s8 = smov [#allocation2]  }
   0xe   : > { %s179_s9 = sshll.u32 %s677_s8, 4  ;;  %s678_s10 = smov 128   ;;  %s180_s9 = int_to_ptr.vmem [resolvable:$true] %s179_s9 }
   0xf   : > { %p524_p11 = pneg %p161_p10  ;;  %s679_s11 = smov 8  }
  0x10   : > { %205 = sbr.rel (%p161_p10) target bundleno = 766 (0x2fe), region = 40 }
  0x11   : > { %p525_p12 = pnand %p532_p9, %p524_p11 }
  0x13   : > { %527 = dma.hbm_to_vmem [thread:$0]  (!%p525_p12), %s178_s7, 1024, %s180_s9, [#allocation3], %s678_s10, %s678_s10, %s679_s11  }
  0x15   : > { %654 = dma.done.wait (%p532_p9), [#allocation3], 1024  }
  0x16   : > { %656 = vsyncadd (%p532_p9), [#allocation3], 4294966272  ;;  %p232_p13 = scmp.lt.s32.totalorder %s732_s22, 1  ;;  %v240_v0 = vld [vmem:[%s835_s1 + $0x18] sm:$0xff]  ;;  %v239_v1 = vld [vmem:[%s835_s1 + $0x10] sm:$0xff]  ;;  %vm241_vm0 = vcmask 261120   ;;  %s434_s16 = scalar_lea.hbm %s839_s5, %s732_s22 }
  0x17   : > { %257 = vmatpush.msra.mxu0 %v240_v0  ;;  %v238_v2 = vld [vmem:[%s835_s1 + $0x8] sm:$0xff]  ;;  %v237_v3 = vld [vmem:[%s835_s1] sm:$0xff]  ;;  %vm265_vm1 = vcmask 64512   ;;  %v302_v10 = vld [vmem:[#allocation2 + $0x18] sm:$0xff]  ;;  %vm388_vm6 = vcmask 253952   ;;  %v680_v61 = vmov 32.0  }
  0x18   : > { %s233_s12 = scalar_select %p232_p13, %s732_s22, 1  ;;  %v301_v11 = vld [vmem:[#allocation2 + $0x10] sm:$0xff]  ;;  %v324_v12 = vld [vmem:[%s836_s2] sm:$0xff]  ;;  %316 = vmatpush.msra.mxu1 %v302_v10  ;;  %v300_v20 = vld [vmem:[#allocation2 + $0x8] sm:$0xff] }
  0x19   : > { %258 = vmatpush.msra.mxu0 %v239_v1  ;;  %343 = vmatpush.msra.mxu2 %v324_v12  ;;  %v299_v21 = vld [vmem:[#allocation2] sm:$0xff]  ;;  %v360_v39 = vld [vmem:[#allocation2 + $0x38] sm:$0xff]  ;;  %v359_v40 = vld [vmem:[#allocation2 + $0x30] sm:$0xff]  ;;  %s438_s25 = sshll.u32 %s434_s16, 4  ;;  %s629_s8 = scalar_lea.hbm %s839_s5, 2  ;;  %s439_s25 = int_to_ptr.hbm [resolvable:$true] %s438_s25 }
  0x1a   : > { %s511_s13 = sshll.u32 %s233_s12, 3  ;;  %317 = vmatpush.msra.mxu1 %v301_v11  ;;  %379 = vmatpush.msra.mxu3 %v360_v39  ;;  %v358_v41 = vld [vmem:[#allocation2 + $0x28] sm:$0xff]  ;;  %v357_v42 = vld [vmem:[#allocation2 + $0x20] sm:$0xff]  ;;  %s623_s30 = sshra.s32 %s439_s25, 4  ;;  %s624_s30 = int_to_ptr.hbm [resolvable:$true] %s623_s30 }
  0x1b   : > { %s235_s6 = scalar_lea.vmem %s834_s0, %s511_s13  ;;  %259 = vmatpush.msra.mxu0 %v238_v2  ;;  %v298_v43 = vld [vmem:[%s838_s4] sm:$0xff]  ;;  %s230_s13 = sand.u32 1, %s667_s19  }
  0x1c   : > { %v236_v4 = vld [vmem:[%s235_s6] sm:$0xff]  ;;  %318 = vmatpush.msra.mxu1 %v300_v20  ;;  %380 = vmatpush.msra.mxu3 %v359_v40  ;;  %v303_v44 = vperm.slane %v298_v43, 1  ;;  %v362_v56 = vrot.slane %v298_v43, 2  ;;  %v421_v20 = vrot.slane %v298_v43, 4  ;;  %s231_s17 = scalar_lea.vmem [#allocation5], %s230_s13  ;;  %s426_s26 = scalar_lea.sflag [#allocation4], %s230_s13 }
  0x1d   : > { %260 = vmatpush.msra.mxu0 %v237_v3  ;;  %s436_s23 = sshll.u32 %s231_s17, 4  ;;  %s625_s6 = scalar_lea.hbm %s624_s30, 1  ;;  %s437_s23 = int_to_ptr.vmem [resolvable:$true] %s436_s23 }
  0x1e   : > { %512 = vmatmul.msk.f32.vlgmr.msra.gmra.mxu0 %vm241_vm0, %v236_v4  ;;  %319 = vmatpush.msra.mxu1 %v299_v21  ;;  %p626_p0 = scmp.ne.s32.totalorder %s624_s30, %s625_s6  ;;  %p630_p3 = scmp.lt.s32.totalorder %s624_s30, %s839_s5 }
  0x1f   : > { %513 = vmatmul.msk.f32.vlgmr.msra.gmra.mxu1 %vm241_vm0, %v236_v4  ;;  %381 = vmatpush.msra.mxu3 %v358_v41  ;;  %p631_p4 = scmp.lt.s32.totalorder %s629_s8, %s625_s6 }
  0x20   : > { %p627_p1 = pnand %p626_p0, %p749_p5 }
  0x21   : > { %382 = vmatpush.msra.mxu3 %v357_v42  ;;  %p632_p7 = por %p631_p4, %p630_p3 }
  0x22   : > { %p628_p2 = pneg %p627_p1 }
  0x24   : > { %p633_p8 = pnand %p632_p7, %p628_p2 }
  0x9b   : > { %v262_v5 = vpop.f32.mrf.mxu0 }
  0x9c   : > { %v266_v6 = vsel %vm265_vm1, %v262_v5, -inf  ;;  %v321_v45 = vpop.f32.mrf.mxu1 }
  0x9d   : > { %v267_v7 = vrot.slane %v266_v6, 4  ;;  %v322_v46 = vadd.f32 %v321_v45, %v303_v44 }
  0x9f   : > { %v268_v8 = vmax.f32 %v266_v6, %v267_v7 }
  0xa1   : > { %v269_v9 = vrot.slane %v268_v8, 2 }
  0xa3   : > { %v270_v13 = vmax.f32 %v268_v8, %v269_v9 }
  0xa5   : > { %v271_v14 = vrot.slane %v270_v13, 1 }
  0xa7   : > { %v272_v15 = vmax.f32 %v270_v13, %v271_v14 }
  0xa9   : > { %v273_v16 = vsub.f32 %v262_v5, %v272_v15 }
  0xab   : > { %v274_v17 = vmul.f32 1.442695, %v273_v16 }
  0xad   : > { %571 = vpow2.f32 %v274_v17 }
  0xb3   : > { %v572_v18 = vpop.eup %571 }
  0xb4   : > { %v276_v19 = vsel %vm265_vm1, %v572_v18, 0.0 }
  0xb5   : > { %v277_v22 = vrot.slane %v276_v19, 4 }
  0xb7   : > { %v278_v23 = vadd.f32 %v277_v22, %v276_v19 }
  0xb9   : > { %v279_v24 = vrot.slane %v278_v23, 2 }
  0xbb   : > { %v280_v25 = vadd.f32 %v279_v24, %v278_v23 }
  0xbd   : > { %v281_v26 = vrot.slane %v280_v25, 1 }
  0xbf   : > { %v282_v27 = vadd.f32 %v281_v26, %v280_v25 }
  0xc1   : > { %573 = vrcp.f32 %v282_v27  ;;  %v294_v31 = vand.u32 2147483648, %v282_v27  ;;  %v292_v33 = vand.u32 2147483647, %v282_v27  ;;  %vm288_vm3 = vweird.f32 %v282_v27 }
  0xc2   : > { %575 = vrcp.f32 %v680_v61 }
  0xc3   : > { %v295_v35 = vor.u32 1.1754944e-38, %v294_v31  ;;  %vm293_vm5 = vcmp.eq.f32.partialorder %v292_v33, 8.507059e+37 }
  0xc7   : > { %v574_v28 = vpop.eup %573 }
  0xc8   : > { %v284_v29 = vmul.f32 %v574_v28, %v282_v27  ;;  %vm289_vm2 = vweird.f32 %v574_v28  ;;  %v576_v62 = vpop.eup %575 }
  0xc9   : > { %vm290_vm4 = vmor %vm288_vm3, %vm289_vm2  ;;  %v393_v63 = vmul.f32 32.0, %v576_v62  ;;  %vm397_vm7 = vweird.f32 %v576_v62 }
  0xca   : > { %v285_v30 = vsub.f32 1.0, %v284_v29 }
  0xcb   : > { %v394_v0 = vsub.f32 1.0, %v393_v63 }
  0xcc   : > { %v286_v32 = vmul.f32 %v574_v28, %v285_v30 }
  0xcd   : > { %v395_v1 = vmul.f32 %v576_v62, %v394_v0 }
  0xce   : > { %v287_v34 = vadd.f32 %v574_v28, %v286_v32 }
  0xcf   : > { %v396_v2 = vadd.f32 %v576_v62, %v395_v1 }
  0xd0   : > { %v291_v36 = vsel %vm290_vm4, %v574_v28, %v287_v34 }
  0xd1   : > { %v296_v37 = vsel %vm293_vm5, %v295_v35, %v291_v36  ;;  %v398_v3 = vsel %vm397_vm7, %v576_v62, %v396_v2 }
  0xd2   : > { %v297_v38 = vmul.f32 %v572_v18, %v296_v37  ;;  %v418_v18 = vrot.slane %v298_v43, 3 }
  0xd4   : > { %514 = vmatmul.msk.f32.vlgmr.msra.gmra.mxu2 %vm265_vm1, %v297_v38 }
 0x157   : > { %v345_v47 = vpop.f32.mrf.mxu2 }
 0x158   : > { %v348_v48 = vmul.f32 %v345_v47, %v322_v46 }
 0x15a   : > { %v349_v49 = vsel %vm241_vm0, %v348_v48, 0.0 }
 0x15b   : > { %v350_v50 = vrot.slane %v349_v49, 4 }
 0x15d   : > { %v351_v51 = vadd.f32 %v350_v50, %v349_v49 }
 0x15f   : > { %v352_v52 = vrot.slane %v351_v51, 2 }
 0x161   : > { %v353_v53 = vadd.f32 %v352_v52, %v351_v51 }
 0x163   : > { %v354_v54 = vrot.slane %v353_v53, 1 }
 0x165   : > { %v355_v55 = vadd.f32 %v354_v54, %v353_v53 }
 0x167   : > { %515 = vmatmul.msk.f32.vlgmr.msra.gmra.mxu3 %vm241_vm0, %v355_v55 }
 0x1ea   : > { %v384_v57 = vpop.f32.mrf.mxu3 }
 0x1eb   : > { %v385_v58 = vadd.f32 %v384_v57, %v362_v56 }
 0x1ed   : > { %v387_v59 = vadd.f32 %v385_v58, %v298_v43 }
 0x1ef   : > { %v389_v60 = vsel %vm388_vm6, %v387_v59, 0.0 }
 0x1f0   : > { %390 = vadd.xlane.f32.xlu0 %v389_v60 }
 0x263   : > { %v391_v4 = vpop.xlane.xlu0 %390 }
 0x264   : > { %v399_v5 = vmul.f32 %v398_v3, %v391_v4 }
 0x266   : > { %v400_v6 = vsub.f32 %v387_v59, %v399_v5 }
 0x268   : > { %v401_v7 = vmul.f32 %v400_v6, %v400_v6 }
 0x26a   : > { %v402_v8 = vsel %vm388_vm6, %v401_v7, 0.0 }
 0x26b   : > { %403 = vadd.xlane.f32.xlu0 %v402_v8 }
 0x2de   : > { %v404_v9 = vpop.xlane.xlu0 %403 }
 0x2df   : > { %v405_v10 = vmul.f32 %v404_v9, %v398_v3 }
 0x2e1   : > { %v406_v11 = vadd.f32 1e-05, %v405_v10 }
 0x2e3   : > { %577 = vrsqrt.f32 %v406_v11  ;;  %vm413_vm9 = vweird.f32 %v406_v11 }
 0x2e9   : > { %v578_v12 = vpop.eup %577 }
 0x2ea   : > { %v408_v13 = vmul.f32 %v578_v12, %v406_v11  ;;  %vm414_vm8 = vweird.f32 %v578_v12 }
 0x2eb   : > { %vm415_vm10 = vmor %vm413_vm9, %vm414_vm8 }
 0x2ec   : > { %v409_v14 = vmul.f32 %v578_v12, %v408_v13 }
 0x2ee   : > { %v410_v15 = vmul.f32 0.5, %v409_v14 }
 0x2f0   : > { %v411_v16 = vsub.f32 1.5, %v410_v15 }
 0x2f2   : > { %v412_v17 = vmul.f32 %v578_v12, %v411_v16 }
 0x2f4   : > { %v416_v19 = vsel %vm415_vm10, %v578_v12, %v412_v17 }
 0x2f5   : > { %v417_v21 = vmul.f32 %v416_v19, %v400_v6 }
 0x2f7   : > { %v420_v22 = vmul.f32 %v418_v18, %v417_v21 }
 0x2f9   : > { %v423_v23 = vadd.f32 %v421_v20, %v420_v22 }
 0x2fb   : > { %424 = vst.msk [vmem:[%s231_s17] sm:$0x1] %vm388_vm6, %v423_v23 }
 0x2fc   : > { %636 = shalt.err (!%p633_p8)
}
 0x2fd   : > { %522 = dma.vmem_to_hbm [thread:$0]  (%p749_p5), %s437_s23, 16, %s439_s25, %s426_s26  }
 0x2fe PF: > { %p534_p9 = scmp.ge.s32.totalorder %s675_s21, 2  ;;  %s450_s11 = sand.u32 1, %s663_s18  }
 0x2ff   : > { %s451_s12 = scalar_lea.sflag [#allocation4], %s450_s11 }
 0x300   : > { %p529_p10 = pnand %p534_p9, %p753_p6 }
 0x302   : > { %p530_p11 = pneg %p529_p10 }
 0x304   : > { %658 = dma.done.wait (%p530_p11), %s451_s12, 16  }
 0x305   : > { %660 = vsyncadd (%p530_p11), %s451_s12, 4294967280  ;;  %p16_p12 = scmp.ge.s32.totalorder %s736_s24, 4   ;;  %s842_s18 = smov %s667_s19 }
 0x306   : > { %s843_s19 = smov %s671_s20  ;;  %s844_s20 = smov %s747_s27 }
 0x307   : > { %s845_s21 = smov %s736_s24  ;;  %18 = sbr.rel (!%p16_p12) target bundleno = 4 (0x4), region = 81 }
 0x30c   :  { %456 = vsyncpa [#allocation3], 1 }
 0x30d   :  { %458 = vsyncpa [#allocation3 + $0x1], 1 }
 0x30e   :  { %459 = vsyncpa [#allocation4], 1 }
 0x30f   :  { %461 = vsyncpa [#allocation4 + $0x1], 1 }

</bundles_post_ra>
